<compile_context>
chip_gen: v7x
topology: tpu7x:2x2x1
jax: 0.10.0
libtpu: 0.0.40
codegen_flags: <defaults>
</compile_context>

<pallas_src>
import functools

import jax
import jax.numpy as jnp
from jax.experimental import pallas as pl
from jax.experimental.pallas import tpu as pltpu

IN_F = 3        # input_layer:  Linear(3, 5)
HID_F = 5
OUT_F = 5       # output_layer: Linear(5, 5)
LANE = 128      # hidden dim is padded to the lane width *inside VMEM only*
SUBLANE = 8     # f32 sublane granule for the batch block dim
MAX_TILE_B = 2048   # batch rows per grid step (review: 1024-2048)


def _round_up(x, m):
    return (x + m - 1) // m * m


def bp_kernel(x_ref, w1_ref, b1_ref, w2_ref, b2_ref, o_ref):
    """One batch tile:  out = relu(x @ W1^T + b1) @ W2^T + b2.

    x_ref : (tile_b, 3)  f32  -- streamed, un-padded (lane dim == full dim)
    w1_ref: (3, 128)     f32  -- W1^T, lanes >= 5 are 0 (VMEM-resident)
    b1_ref: (1, 128)     f32  -- lanes >= 5 are 0
    w2_ref: (128, 128)   f32  -- W2^T in [:5, :5], rest 0
    b2_ref: (1, 5)       f32
    o_ref : (tile_b, 5)  f32  -- 5-lane masked store (cheap vs saved HBM)
    """
    x = x_ref[...]                      # (tile_b, 3)
    w1 = w1_ref[...]                    # (3, 128)

    # Layer 1 on the VPU: 3 broadcast FMAs -> lane-dense (tile_b, 128) hidden.
    # Padded hidden lanes are relu(0 + 0) == 0, so layer 2 is exact.
    h = x[:, 0:1] * w1[0:1, :] + b1_ref[...]
    for k in range(1, IN_F):
        h = h + x[:, k:k + 1] * w1[k:k + 1, :]
    h = jnp.maximum(h, 0.0)

    # Layer 2 on the MXU with well-tiled (tile_b,128)x(128,128) operands.
    y = jnp.dot(h, w2_ref[...], preferred_element_type=jnp.float32)
    o_ref[...] = (y[:, :OUT_F] + b2_ref[...]).astype(o_ref.dtype)


def prepare_params(w1, b1, w2, b2):
    """Bake torch-layout params (W: (out,in), b: (out,)) into zero-padded f32
    blocks ONCE, outside the per-call path."""
    f32 = jnp.float32
    w1_p = jnp.zeros((IN_F, LANE), f32).at[:, :HID_F].set(jnp.asarray(w1, f32).T)
    b1_p = jnp.zeros((1, LANE), f32).at[0, :HID_F].set(jnp.asarray(b1, f32))
    w2_p = jnp.zeros((LANE, LANE), f32).at[:HID_F, :OUT_F].set(jnp.asarray(w2, f32).T)
    b2_p = jnp.asarray(b2, f32).reshape(1, OUT_F)
    return w1_p, b1_p, w2_p, b2_p


def _choose_tile_b(batch):
    """Batch rows per grid step.

    - batch <= 1024: single step with a full-extent batch block (always a
      legal block shape, even for batch not a multiple of 8).
    - otherwise: a multiple-of-8 tile capped at MAX_TILE_B, chosen so the
      grid has >= 2 steps (both v7x TensorCores get work); the ragged last
      block is masked by Pallas, so there is no host-side batch padding.
    """
    if batch <= 1024:
        return batch
    if batch <= 2 * MAX_TILE_B:
        return _round_up(pl.cdiv(batch, 2), SUBLANE)
    return MAX_TILE_B


@jax.jit
def bp_forward(x, w1_p, b1_p, w2_p, b2_p):
    """x: (B, 3); padded params from prepare_params. Returns (B, 5) f32."""
    x = x.astype(jnp.float32)
    B = x.shape[0]

    tile_b = _choose_tile_b(B)
    grid = (pl.cdiv(B, tile_b),)

    # Un-padded streaming layout: ~32 bytes of HBM per row + tiny weights.
    flops = 2 * B * (IN_F * HID_F + HID_F * OUT_F)
    bytes_accessed = 4 * (B * (IN_F + OUT_F) + w1_p.size + b1_p.size
                          + w2_p.size + b2_p.size)

    return pl.pallas_call(
        bp_kernel,
        out_shape=jax.ShapeDtypeStruct((B, OUT_F), jnp.float32),
        grid_spec=pltpu.PrefetchScalarGridSpec(
            num_scalar_prefetch=0,
            grid=grid,
            in_specs=[
                # x batch tile, un-padded: last block dim == full array dim 3.
                pl.BlockSpec((tile_b, IN_F), lambda i: (i, 0)),
                # Weights/biases: constant index maps -> DMA'd once, stay
                # VMEM-resident across grid steps.
                pl.BlockSpec((IN_F, LANE), lambda i: (0, 0)),
                pl.BlockSpec((1, LANE), lambda i: (0, 0)),
                pl.BlockSpec((LANE, LANE), lambda i: (0, 0)),
                pl.BlockSpec((1, OUT_F), lambda i: (0, 0)),
            ],
            # Output written directly as (B, 5) -- no 128-lane pad, no slice.
            out_specs=pl.BlockSpec((tile_b, OUT_F), lambda i: (i, 0)),
        ),
        compiler_params=pltpu.CompilerParams(
            dimension_semantics=("parallel",),   # megacore sharding on v7x
            vmem_limit_bytes=32 * 1024 * 1024,   # safe on v5e/v6e/v7x
        ),
        cost_estimate=pl.CostEstimate(
            flops=flops, transcendentals=0, bytes_accessed=bytes_accessed),
    )(x, w1_p, b1_p, w2_p, b2_p)


def bp_reference(x, w1, b1, w2, b2):
    h = jnp.maximum(x @ w1.T + b1, 0.0)
    return h @ w2.T + b2


if __name__ == "__main__":
    key = jax.random.PRNGKey(0)
    kx, k1, k2, k3, k4 = jax.random.split(key, 5)

    # Shapes from BP.__init__: Linear(3,5) -> W1 (5,3), b1 (5,);
    #                          Linear(5,5) -> W2 (5,5), b2 (5,).
    w1 = jax.random.uniform(k1, (HID_F, IN_F), minval=-0.5, maxval=0.5, dtype=jnp.float32)
    b1 = jax.random.uniform(k2, (HID_F,), minval=-0.5, maxval=0.5, dtype=jnp.float32)
    w2 = jax.random.uniform(k3, (OUT_F, HID_F), minval=-0.4, maxval=0.4, dtype=jnp.float32)
    b2 = jax.random.uniform(k4, (OUT_F,), minval=-0.4, maxval=0.4, dtype=jnp.float32)

    params = prepare_params(w1, b1, w2, b2)   # one-time bake (transpose + pad)

    # Small batch: single grid step, full-extent batch block.
    B = 8
    x = jax.random.normal(kx, (B, IN_F), dtype=jnp.float32)
    out = jax.block_until_ready(bp_forward(x, *params))
    ref = bp_reference(x, w1, b1, w2, b2)
    assert out.shape == (B, OUT_F)
    assert jnp.allclose(out, ref, atol=1e-5, rtol=1e-5), "mismatch vs reference (B=8)"

    # Ragged multi-step batch: exercises the >=2-step grid + masked last block.
    B2 = 1030
    x2 = jax.random.normal(kx, (B2, IN_F), dtype=jnp.float32)
    out2 = jax.block_until_ready(bp_forward(x2, *params))
    ref2 = bp_reference(x2, w1, b1, w2, b2)
    assert out2.shape == (B2, OUT_F)
    assert jnp.allclose(out2, ref2, atol=1e-5, rtol=1e-5), "mismatch vs reference (B=1030)"

    print("KERNEL_OK")
</pallas_src>

<mosaic_0001>
module attributes {stable_mosaic.version = 11 : i64} {
  func.func @bp_kernel(%arg0: i32, %arg1: memref<8x3xf32, #tpu.memory_space<vmem>>, %arg2: memref<3x128xf32, #tpu.memory_space<vmem>>, %arg3: memref<1x128xf32, #tpu.memory_space<vmem>>, %arg4: memref<128x128xf32, #tpu.memory_space<vmem>>, %arg5: memref<1x5xf32, #tpu.memory_space<vmem>>, %arg6: memref<8x5xf32, #tpu.memory_space<vmem>>) attributes {dimension_semantics = [#tpu.dimension_semantics<parallel>], iteration_bounds = array<i64: 1>, scalar_prefetch = 0 : i64, scratch_operands = 0 : i64, tpu.core_type = #tpu.core_type<tc>, window_params = [{transform_indices = @transform_0, window_bounds = array<i64: 8, 3>}, {pipeline_mode = #tpu.pipeline_mode<synchronous>, transform_indices = @transform_1, window_bounds = array<i64: 3, 128>}, {pipeline_mode = #tpu.pipeline_mode<synchronous>, transform_indices = @transform_2, window_bounds = array<i64: 1, 128>}, {pipeline_mode = #tpu.pipeline_mode<synchronous>, transform_indices = @transform_3, window_bounds = array<i64: 128, 128>}, {pipeline_mode = #tpu.pipeline_mode<synchronous>, transform_indices = @transform_4, window_bounds = array<i64: 1, 5>}, {transform_indices = @transform_5, window_bounds = array<i64: 8, 5>}]} {
    %c0 = arith.constant 0 : index
    %c0_0 = arith.constant 0 : index
    %0 = vector.load %arg1[%c0, %c0_0] : memref<8x3xf32, #tpu.memory_space<vmem>>, vector<8x3xf32>
    %c0_1 = arith.constant 0 : index
    %c0_2 = arith.constant 0 : index
    %1 = vector.load %arg2[%c0_1, %c0_2] : memref<3x128xf32, #tpu.memory_space<vmem>>, vector<3x128xf32>
    %2 = vector.extract_strided_slice %0 {offsets = [0, 0], sizes = [8, 1], strides = [1, 1]} : vector<8x3xf32> to vector<8x1xf32>
    %3 = vector.extract_strided_slice %1 {offsets = [0, 0], sizes = [1, 128], strides = [1, 1]} : vector<3x128xf32> to vector<1x128xf32>
    %4 = vector.broadcast %2 : vector<8x1xf32> to vector<8x128xf32>
    %5 = vector.broadcast %3 : vector<1x128xf32> to vector<8x128xf32>
    %6 = arith.mulf %4, %5 : vector<8x128xf32>
    %c0_3 = arith.constant 0 : index
    %c0_4 = arith.constant 0 : index
    %7 = vector.load %arg3[%c0_3, %c0_4] : memref<1x128xf32, #tpu.memory_space<vmem>>, vector<1x128xf32>
    %8 = vector.broadcast %7 : vector<1x128xf32> to vector<8x128xf32>
    %9 = arith.addf %6, %8 : vector<8x128xf32>
    %10 = vector.extract_strided_slice %0 {offsets = [0, 1], sizes = [8, 1], strides = [1, 1]} : vector<8x3xf32> to vector<8x1xf32>
    %11 = vector.extract_strided_slice %1 {offsets = [1, 0], sizes = [1, 128], strides = [1, 1]} : vector<3x128xf32> to vector<1x128xf32>
    %12 = vector.broadcast %10 : vector<8x1xf32> to vector<8x128xf32>
    %13 = vector.broadcast %11 : vector<1x128xf32> to vector<8x128xf32>
    %14 = arith.mulf %12, %13 : vector<8x128xf32>
    %15 = arith.addf %9, %14 : vector<8x128xf32>
    %16 = vector.extract_strided_slice %0 {offsets = [0, 2], sizes = [8, 1], strides = [1, 1]} : vector<8x3xf32> to vector<8x1xf32>
    %17 = vector.extract_strided_slice %1 {offsets = [2, 0], sizes = [1, 128], strides = [1, 1]} : vector<3x128xf32> to vector<1x128xf32>
    %18 = vector.broadcast %16 : vector<8x1xf32> to vector<8x128xf32>
    %19 = vector.broadcast %17 : vector<1x128xf32> to vector<8x128xf32>
    %20 = arith.mulf %18, %19 : vector<8x128xf32>
    %21 = arith.addf %15, %20 : vector<8x128xf32>
    %cst = arith.constant 0.000000e+00 : f32
    %22 = vector.broadcast %cst : f32 to vector<8x128xf32>
    %23 = arith.maximumf %21, %22 : vector<8x128xf32>
    %c0_5 = arith.constant 0 : index
    %c0_6 = arith.constant 0 : index
    %24 = vector.load %arg4[%c0_5, %c0_6] : memref<128x128xf32, #tpu.memory_space<vmem>>, vector<128x128xf32>
    %cst_7 = arith.constant dense<0.000000e+00> : vector<8x128xf32>
    %25 = tpu.matmul %23, %24, %cst_7 {dimension_numbers = #tpu.dot_dimension_numbers<[1], [0], [0], [1], [0, 0, 1, 1], [], []>} : vector<8x128xf32>, vector<128x128xf32>, vector<8x128xf32> -> vector<8x128xf32>
    %26 = vector.extract_strided_slice %25 {offsets = [0, 0], sizes = [8, 5], strides = [1, 1]} : vector<8x128xf32> to vector<8x5xf32>
    %c0_8 = arith.constant 0 : index
    %c0_9 = arith.constant 0 : index
    %27 = vector.load %arg5[%c0_8, %c0_9] : memref<1x5xf32, #tpu.memory_space<vmem>>, vector<1x5xf32>
    %28 = vector.broadcast %27 : vector<1x5xf32> to vector<8x5xf32>
    %29 = arith.addf %26, %28 : vector<8x5xf32>
    %c0_10 = arith.constant 0 : index
    %c0_11 = arith.constant 0 : index
    %30 = vector.load %arg6[%c0_10, %c0_11] : memref<8x5xf32, #tpu.memory_space<vmem>>, vector<8x5xf32>
    tpu.vector_store %arg6[%c0_10, %c0_11], %29 {strides = array<i32>} : memref<8x5xf32, #tpu.memory_space<vmem>>, vector<8x5xf32>,
    return
  }
  func.func @transform_0(%arg0: i32) -> (i32, i32) {
    %c0_i32 = arith.constant 0 : i32
    %c0_i32_0 = arith.constant 0 : i32
    return %arg0, %c0_i32 : i32, i32
  }
  func.func @transform_1(%arg0: i32) -> (i32, i32) {
    %c0_i32 = arith.constant 0 : i32
    %c0_i32_0 = arith.constant 0 : i32
    %c0_i32_1 = arith.constant 0 : i32
    return %c0_i32, %c0_i32_0 : i32, i32
  }
  func.func @transform_2(%arg0: i32) -> (i32, i32) {
    %c0_i32 = arith.constant 0 : i32
    %c0_i32_0 = arith.constant 0 : i32
    %c0_i32_1 = arith.constant 0 : i32
    return %c0_i32, %c0_i32_0 : i32, i32
  }
  func.func @transform_3(%arg0: i32) -> (i32, i32) {
    %c0_i32 = arith.constant 0 : i32
    %c0_i32_0 = arith.constant 0 : i32
    %c0_i32_1 = arith.constant 0 : i32
    return %c0_i32, %c0_i32_0 : i32, i32
  }
  func.func @transform_4(%arg0: i32) -> (i32, i32) {
    %c0_i32 = arith.constant 0 : i32
    %c0_i32_0 = arith.constant 0 : i32
    %c0_i32_1 = arith.constant 0 : i32
    return %c0_i32, %c0_i32_0 : i32, i32
  }
  func.func @transform_5(%arg0: i32) -> (i32, i32) {
    %c0_i32 = arith.constant 0 : i32
    %c0_i32_0 = arith.constant 0 : i32
    return %arg0, %c0_i32 : i32, i32
  }
}

</mosaic_0001>

<bundles_post_ra>
// kernel: bp_forward.1
= control target key start
LH: loop header
LB: loop body
LE: loop exit
PB: predicated region body
PF: predicated region fallthrough
CT: control target
= control target key end

     0   :  { %10 = vsyncpa [#allocation3], 0  ;;  %s403_s0 = inlined_call_operand.vmem [shape: f32[8,3], index: 0, kind: input, shape index: {}]   ;;  %s404_s1 = inlined_call_operand.vmem [shape: f32[3,128], index: 1, kind: input, shape index: {}]   ;;  %s405_s2 = inlined_call_operand.vmem [shape: f32[1,128], index: 2, kind: input, shape index: {}]   ;;  %s406_s3 = inlined_call_operand.hbm [shape: f32[128,128], index: 3, kind: input, shape index: {}]   ;;  %s407_s4 = inlined_call_operand.vmem [shape: f32[1,5], index: 4, kind: input, shape index: {}]   ;;  %s408_s5 = inlined_call_operand.hbm [shape: f32[8,5], index: 5, kind: output, shape index: {}]  }
   0x1   :  { %11 = vsyncpa [#allocation4], 0  ;;  %s327_s18 = smov [#allocation2]   ;;  %s279_s22 = scalar_lea.hbm %s406_s3, 2048 }
   0x2   :  { %s23_s19 = sshll.u32 %s327_s18, 4  ;;  %p280_p0 = scmp.ne.s32.totalorder %s406_s3, %s279_s22  ;;  %s24_s19 = int_to_ptr.vmem [resolvable:$true] %s23_s19 }
   0x3   :  { %p283_p1 = scmp.lt.u32.totalorder %s279_s22, %s406_s3 }
   0x5   :  { %p285_p2 = pnand %p283_p1, %p280_p0 }
   0x7   :  { %288 = shalt.err (!%p285_p2)
}
   0x8   :  { %s289_s27 = scalar_lea.vmem %s24_s19, 2048  ;;  %p294_p4 = scmp.lt.s32.totalorder %s24_s19, %s24_s19 }
   0x9   :  { %p290_p3 = scmp.ne.s32.totalorder %s24_s19, %s289_s27  ;;  %p295_p5 = scmp.lt.s32.totalorder %s289_s27, %s289_s27 }
   0xb   :  { %p296_p6 = por %p295_p5, %p294_p4 }
   0xd   :  { %p297_p7 = pnand %p296_p6, %p290_p3 }
   0xf   :  { %300 = shalt.err (!%p297_p7)
}
  0x10   :  { %s328_s28 = smov 128   ;;  %s329_s29 = smov 8  }
  0x11   :  { %29 = dma.hbm_to_vmem [thread:$0]  %s406_s3, 2048, %s24_s19, [#allocation3], %s328_s28, %s328_s28, %s329_s29  }
  0x12   :  { %323 = dma.done.wait [#allocation3], 2048  }
  0x13   :  { %324 = vsyncadd [#allocation3], 4294965248  ;;  %v330_v0 = vmov 0   ;;  %v331_v1 = vmov 2   ;;  %v332_v2 = vmov 0.0|0.0   ;;  %v35_v3 = vld [vmem:[%s403_s0] sm:$0xff]  ;;  %v42_v30 = vlaneseq }
  0x14   :  { %275 = vset.pattern.permute.xlu0 %v330_v0  ;;  %277 = vset.pattern.permute.xlu1 %v331_v1  ;;  %v76_v4 = vld [vmem:[#allocation2] sm:$0xff]  ;;  %v77_v5 = vld [vmem:[#allocation2 + $0x8] sm:$0xff]  ;;  %v78_v7 = vld [vmem:[#allocation2 + $0x10] sm:$0xff]  ;;  %v333_v12 = vmov 1   ;;  %vm334_vm0 = vmmov 0   ;;  %v335_v19 = vmov 0.0  }
  0x15   :  { %241 = vmatprep.subr.bf16.mxu0 %v332_v2  ;;  %39 = vperm.xlu0 %275, %v35_v3   ;;  %v242_v6 = vpack.c.bf16 %v77_v5, %v76_v4  ;;  %v79_v8 = vld [vmem:[#allocation2 + $0x18] sm:$0xff]  ;;  %v80_v10 = vld [vmem:[#allocation2 + $0x20] sm:$0xff]  ;;  %v81_v11 = vld [vmem:[#allocation2 + $0x28] sm:$0xff]  ;;  %v43_v31 = vshrl.u32 %v42_v30, 7  ;;  %s336_s12 = smov [#allocation5]   ;;  %vm170_vm1 = vcmask 39936  }
  0x16   :  { %66 = vperm.xlu1 %277, %v35_v3   ;;  %v245_v9 = vpack.c.bf16 %v79_v8, %v78_v7  ;;  %v248_v13 = vpack.c.bf16 %v81_v11, %v80_v10  ;;  %v82_v14 = vld [vmem:[#allocation2 + $0x30] sm:$0xff]  ;;  %v83_v15 = vld [vmem:[#allocation2 + $0x38] sm:$0xff]  ;;  %v84_v17 = vld [vmem:[#allocation2 + $0x40] sm:$0xff]  ;;  %238 = vmatprep.mubr.msk.f32.mxu0 %vm334_vm0, %v335_v19  ;;  %s178_s13 = sshll.u32 %s336_s12, 4  ;;  %s179_s13 = int_to_ptr.vmem [resolvable:$true] %s178_s13 }
  0x17   :  { %243 = vmatpush3.bf16.msra.mxu0 %v242_v6  ;;  %v251_v16 = vpack.c.bf16 %v83_v15, %v82_v14  ;;  %v85_v18 = vld [vmem:[#allocation2 + $0x48] sm:$0xff]  ;;  %v86_v21 = vld [vmem:[#allocation2 + $0x50] sm:$0xff]  ;;  %v87_v22 = vld [vmem:[#allocation2 + $0x58] sm:$0xff]  ;;  %v44_v32 = vsub.s32 0, %v43_v31  ;;  %v61_v35 = vsub.s32 1, %v43_v31  ;;  %v71_v36 = vsub.s32 2, %v43_v31  ;;  %p306_p9 = scmp.lt.s32.totalorder %s179_s13, %s179_s13 }
  0x18   :  { %244 = vmatprep.subr.bf16.mxu0 %v332_v2  ;;  %v254_v20 = vpack.c.bf16 %v85_v18, %v84_v17  ;;  %v257_v23 = vpack.c.bf16 %v87_v22, %v86_v21  ;;  %v88_v24 = vld [vmem:[#allocation2 + $0x60] sm:$0xff]  ;;  %v89_v25 = vld [vmem:[#allocation2 + $0x68] sm:$0xff]  ;;  %v90_v27 = vld [vmem:[#allocation2 + $0x70] sm:$0xff] }
  0x19   :  { %276 = vset.pattern.permute.xlu0 %v333_v12  ;;  %v260_v26 = vpack.c.bf16 %v89_v25, %v88_v24  ;;  %v91_v28 = vld [vmem:[#allocation2 + $0x78] sm:$0xff]  ;;  %v36_v33 = vld [vmem:[%s404_s1] sm:$0x7] }
  0x1a   :  { %56 = vperm.xlu0 %276, %v35_v3   ;;  %v263_v29 = vpack.c.bf16 %v91_v28, %v90_v27  ;;  %v45_v34 = vrot.slane %v36_v33, %v44_v32  ;;  %v62_v39 = vrot.slane %v36_v33, %v61_v35  ;;  %v72_v40 = vrot.slane %v36_v33, %v71_v36  ;;  %v187_v41 = vld [vmem:[%s405_s2] ss:$0 sm:$0xff]  ;;  %s301_s2 = scalar_lea.vmem %s179_s13, 128 }
  0x1b   :  { %246 = vmatpush3.bf16.msra.mxu0 %v245_v9  ;;  %v188_v50 = vld [vmem:[%s407_s4] ss:$0 sm:$0xff]  ;;  %p302_p8 = scmp.ne.s32.totalorder %s179_s13, %s301_s2  ;;  %p307_p10 = scmp.lt.s32.totalorder %s301_s2, %s301_s2 }
  0x1c   :  { %247 = vmatprep.subr.bf16.mxu0 %v332_v2 }
  0x1d   :  { %p308_p11 = por %p307_p10, %p306_p9 }
  0x1e   :  { %278 = vset.pattern.permute.xlu0 %v331_v1 }
  0x1f   :  { %249 = vmatpush3.bf16.msra.mxu0 %v248_v13  ;;  %p309_p12 = pnand %p308_p11, %p302_p8 }
  0x20   :  { %250 = vmatprep.subr.bf16.mxu0 %v332_v2 }
  0x23   :  { %252 = vmatpush3.bf16.msra.mxu0 %v251_v16 }
  0x24   :  { %253 = vmatprep.subr.bf16.mxu0 %v332_v2 }
  0x27   :  { %255 = vmatpush3.bf16.msra.mxu0 %v254_v20 }
  0x28   :  { %256 = vmatprep.subr.bf16.mxu0 %v332_v2 }
  0x2b   :  { %258 = vmatpush3.bf16.msra.mxu0 %v257_v23 }
  0x2c   :  { %259 = vmatprep.subr.bf16.mxu0 %v332_v2 }
  0x2f   :  { %261 = vmatpush3.bf16.msra.mxu0 %v260_v26 }
  0x30   :  { %262 = vmatprep.subr.bf16.mxu0 %v332_v2 }
  0x33   :  { %264 = vmatpush3.bf16.msra.mxu0 %v263_v29 }
  0x94   :  { %v40_v37 = vpop.permute.xlu0 %39 }
  0x95   :  { %v46_v38 = vmul.f32 %v45_v34, %v40_v37  ;;  %v67_v42 = vpop.permute.xlu1 %66 }
  0x96   :  { %v73_v46 = vmul.f32 %v72_v40, %v67_v42 }
  0x97   :  { %v54_v44 = vadd.f32 %v187_v41, %v46_v38 }
  0x99   :  { %v57_v43 = vpop.permute.xlu0 %56 }
  0x9a   :  { %v63_v45 = vmul.f32 %v62_v39, %v57_v43 }
  0x9c   :  { %v64_v47 = vadd.f32 %v63_v45, %v54_v44 }
  0x9e   :  { %v74_v48 = vadd.f32 %v73_v46, %v64_v47 }
  0xa0   :  { %v75_v49 = vmax.f32 %v74_v48, 0.0 }
  0xa2   :  { %239 = vmatmul.mubr.f32.vlgmr.msra.gmra.mrb[0].mxu0 %v75_v49 }
 0x175   :  { %v158_v51 = vpop.f32.mrb[0].mxu0 }
 0x176   :  { %v169_v52 = vadd.f32 %v188_v50, %v158_v51  ;;  %v240_v53 = vpop.f32.mrb[1].mxu0 }
 0x178   :  { %171 = vst.msk [vmem:[#allocation5] sm:$0xff] %vm170_vm1, %v169_v52 }
 0x179   :  { %312 = shalt.err (!%p309_p12)
}
 0x17a   :  { %s313_s16 = scalar_lea.hbm %s408_s5, 128 }
 0x17b   :  { %p314_p13 = scmp.ne.s32.totalorder %s408_s5, %s313_s16  ;;  %p317_p0 = scmp.lt.u32.totalorder %s313_s16, %s408_s5 }
 0x17d   :  { %p319_p1 = pnand %p317_p0, %p314_p13 }
 0x17f   :  { %322 = shalt.err (!%p319_p1)
}
 0x180   :  { %181 = dma.vmem_to_hbm [thread:$0]  %s179_s13, 128, %s408_s5, [#allocation4]  }
 0x181   :  { %325 = dma.done.wait [#allocation4], 128  }
 0x182   :  { %326 = vsyncadd [#allocation4], 4294967168 }
 0x183   :  { %185 = vsyncpa [#allocation3], 1 }
 0x184   :  { %186 = vsyncpa [#allocation4], 1 }

</bundles_post_ra>
